<compile_context>
chip_gen: v5e
topology: v5e:2x2
jax: 0.10.0
libtpu: 0.0.40
codegen_flags: <defaults>
</compile_context>

<pallas_src>
import math

import jax
import jax.numpy as jnp
from jax import lax
from jax.experimental import pallas as pl
from jax.experimental.pallas import tpu as pltpu


_TILE_CANDIDATES = (512, 256, 128, 64, 32, 16, 8)
_MIB = 1024 * 1024


def _vmem_capacity_bytes():
    """Per-core VMEM capacity; falls back to the smallest current part (v7x, 64 MiB)."""
    try:
        return int(pltpu.get_tpu_info().vmem_capacity_bytes)
    except Exception:
        return 64 * _MIB


def _pick_tile(S, fits):
    """Largest MXU-friendly tile dividing S that satisfies the VMEM budget."""
    divisors = [t for t in _TILE_CANDIDATES if S % t == 0]
    if not divisors:
        return S  # full extent -- always layout-legal (block == array dim)
    for t in divisors:
        if fits(t):
            return t
    return divisors[-1]


def _attn_path_vmem_bytes(tq, S, D, in_bytes, out_bytes, attn_bytes):
    q_io = 2 * tq * D * (in_bytes + out_bytes)      # double-buffered Q in / out
    attn_out = 2 * tq * S * attn_bytes              # double-buffered attn writeback tile
    kv = 2 * 2 * S * D * in_bytes                   # K and V (assume double-buffered)
    interm = 3 * tq * S * 4                         # f32 scores / p / fused-normalize copies
    return q_io + attn_out + kv + interm


def _flash_path_vmem_bytes(tq, tk, D, in_bytes, out_bytes):
    q_io = 2 * tq * D * (in_bytes + out_bytes)
    kv = 2 * 2 * tk * D * in_bytes
    scratch = tq * D * 4 + 2 * tq * 4               # acc + m/l accumulators
    interm = 3 * tq * tk * 4                        # f32 s / p / alpha copies
    return q_io + kv + scratch + interm


def _vmem_limit_bytes(needed):
    cap = _vmem_capacity_bytes()
    limit = max(32 * _MIB, needed + 8 * _MIB)       # requested footprint + margin
    # Never request the whole physical VMEM: leave room for Mosaic scratch/spill.
    return int(max(16 * _MIB, min(limit, cap - 12 * _MIB, 100 * _MIB)))


def _scaled_scores(q, k):
    """(Q / sqrt(d_k)) @ K^T in f32, with K consumed in its native (Tk, D) layout."""
    scale = 1.0 / math.sqrt(float(q.shape[-1]))
    if q.dtype == jnp.float32:
        # Exact in f32: fold the scale into Q (Tq*D multiplies, not Tq*Tk).
        q = q * jnp.float32(scale)
        return lax.dot_general(
            q, k, dimension_numbers=(((1,), (1,)), ((), ())),
            preferred_element_type=jnp.float32)
    # Low-precision inputs: keep Q native for full MXU throughput and scale the
    # f32 scores (avoids rounding the scale in bf16).
    s = lax.dot_general(
        q, k, dimension_numbers=(((1,), (1,)), ((), ())),
        preferred_element_type=jnp.float32)
    return s * jnp.float32(scale)


def _sdpa_attn_kernel(q_ref, k_ref, v_ref, out_ref, attn_ref):
    # q_ref: (TQ, D), k_ref/v_ref: (S, D), out_ref: (TQ, D), attn_ref: (TQ, S)
    q = q_ref[...]
    k = k_ref[...]
    v = v_ref[...]

    s = _scaled_scores(q, k)                           # (TQ, S) f32
    m = jnp.max(s, axis=-1, keepdims=True)
    p = jnp.exp(s - m)                                 # unnormalized probabilities
    denom = jnp.sum(p, axis=-1, keepdims=True)
    inv = pl.reciprocal(denom, approx=False)           # exact; (TQ,1) so ~free

    # Feed the MXU the unnormalized p and normalize the small (TQ, D) result,
    # instead of normalizing the (TQ, S) probabilities before the matmul.
    out = jnp.dot(p.astype(v.dtype), v, preferred_element_type=jnp.float32)
    out_ref[...] = (out * inv).astype(out_ref.dtype)

    # Single fused multiply+cast pass over (TQ, S) for the attention writeback.
    attn_ref[...] = (p * inv).astype(attn_ref.dtype)


def _sdpa_flash_kernel(q_ref, k_ref, v_ref, out_ref, m_sc, l_sc, acc_sc):
    # q_ref: (TQ, D), k_ref/v_ref: (TK, D); kv axis is the last ("arbitrary") grid dim.
    ki = pl.program_id(2)

    @pl.when(ki == 0)
    def _init():
        m_sc[...] = jnp.full_like(m_sc, -jnp.inf)
        l_sc[...] = jnp.zeros_like(l_sc)
        acc_sc[...] = jnp.zeros_like(acc_sc)

    q = q_ref[...]
    k = k_ref[...]
    v = v_ref[...]

    s = _scaled_scores(q, k)                           # (TQ, TK) f32
    m_prev = m_sc[...]
    m_new = jnp.maximum(m_prev, jnp.max(s, axis=-1, keepdims=True))
    alpha = jnp.exp(m_prev - m_new)
    p = jnp.exp(s - m_new)
    l_sc[...] = alpha * l_sc[...] + jnp.sum(p, axis=-1, keepdims=True)
    acc_sc[...] = alpha * acc_sc[...] + jnp.dot(
        p.astype(v.dtype), v, preferred_element_type=jnp.float32)
    m_sc[...] = m_new

    @pl.when(ki == pl.num_programs(2) - 1)
    def _finalize():
        out_ref[...] = (acc_sc[...] *
                        pl.reciprocal(l_sc[...], approx=False)).astype(out_ref.dtype)


def scaled_dot_product_attention(query, key, value, *, return_attn=True, attn_dtype=None):
    """Pallas TPU scaled dot-product attention.

    query/key/value: (B, S, D).
    return_attn=True  -> (output (B, S, D), attn (B, S, S))  [PyTorch module parity]
    return_attn=False -> output only, flash-style kernel with no O(S^2) HBM writeback.
    attn_dtype: optional dtype for the attention-matrix output (e.g. bf16 to halve
    the dominant HBM writeback); defaults to the query dtype.
    """
    B, S, D = query.shape
    assert key.shape == (B, S, D) and value.shape == (B, S, D)

    out_dtype = query.dtype
    in_bytes = query.dtype.itemsize
    out_bytes = jnp.dtype(out_dtype).itemsize

    budget = _vmem_capacity_bytes() - 16 * _MIB

    flops = 4 * B * S * S * D                      # QK^T + PV, 2 flops per MAC
    trans = B * S * S                              # one exp per score
    qkv_hbm = 3 * B * S * D * in_bytes
    out_hbm = B * S * D * out_bytes

    if return_attn:
        a_dtype = query.dtype if attn_dtype is None else jnp.dtype(attn_dtype)
        a_bytes = a_dtype.itemsize

        TQ = _pick_tile(
            S, lambda t: _attn_path_vmem_bytes(t, S, D, in_bytes, out_bytes, a_bytes) <= budget)
        needed = _attn_path_vmem_bytes(TQ, S, D, in_bytes, out_bytes, a_bytes)

        grid_spec = pltpu.PrefetchScalarGridSpec(
            num_scalar_prefetch=0,
            grid=(B, S // TQ),
            in_specs=[
                # Q: one (TQ, D) tile per (batch, query-tile) step.
                pl.BlockSpec((pl.Squeezed(), TQ, D), lambda b, qi: (b, qi, 0)),
                # K, V: full (S, D) per batch element; block index only changes at
                # batch boundaries so the pipeline re-fetches them once per batch.
                pl.BlockSpec((pl.Squeezed(), S, D), lambda b, qi: (b, 0, 0)),
                pl.BlockSpec((pl.Squeezed(), S, D), lambda b, qi: (b, 0, 0)),
            ],
            out_specs=[
                pl.BlockSpec((pl.Squeezed(), TQ, D), lambda b, qi: (b, qi, 0)),
                pl.BlockSpec((pl.Squeezed(), TQ, S), lambda b, qi: (b, qi, 0)),
            ],
        )
        cost = pl.CostEstimate(
            flops=int(flops),
            transcendentals=int(trans),
            bytes_accessed=int(qkv_hbm + out_hbm + B * S * S * a_bytes),
        )
        out, attn = pl.pallas_call(
            _sdpa_attn_kernel,
            out_shape=(
                jax.ShapeDtypeStruct((B, S, D), out_dtype),
                jax.ShapeDtypeStruct((B, S, S), a_dtype),
            ),
            grid_spec=grid_spec,
            compiler_params=pltpu.CompilerParams(
                dimension_semantics=("parallel", "parallel"),
                vmem_limit_bytes=_vmem_limit_bytes(needed),
            ),
            cost_estimate=cost,
        )(query, key, value)
        return out, attn

    # ---- flash-style path: no attention-matrix writeback ----
    TQ = _pick_tile(S, lambda t: _flash_path_vmem_bytes(t, t, D, in_bytes, out_bytes) <= budget)
    TK = TQ
    needed = _flash_path_vmem_bytes(TQ, TK, D, in_bytes, out_bytes)

    grid_spec = pltpu.PrefetchScalarGridSpec(
        num_scalar_prefetch=0,
        grid=(B, S // TQ, S // TK),
        in_specs=[
            pl.BlockSpec((pl.Squeezed(), TQ, D), lambda b, qi, ki: (b, qi, 0)),
            pl.BlockSpec((pl.Squeezed(), TK, D), lambda b, qi, ki: (b, ki, 0)),
            pl.BlockSpec((pl.Squeezed(), TK, D), lambda b, qi, ki: (b, ki, 0)),
        ],
        out_specs=pl.BlockSpec((pl.Squeezed(), TQ, D), lambda b, qi, ki: (b, qi, 0)),
        scratch_shapes=[
            pltpu.VMEM((TQ, 1), jnp.float32),   # running max
            pltpu.VMEM((TQ, 1), jnp.float32),   # running denom
            pltpu.VMEM((TQ, D), jnp.float32),   # unnormalized output accumulator
        ],
    )
    cost = pl.CostEstimate(
        flops=int(flops),
        transcendentals=int(trans),
        bytes_accessed=int(qkv_hbm + out_hbm),
    )
    out = pl.pallas_call(
        _sdpa_flash_kernel,
        out_shape=jax.ShapeDtypeStruct((B, S, D), out_dtype),
        grid_spec=grid_spec,
        compiler_params=pltpu.CompilerParams(
            dimension_semantics=("parallel", "parallel", "arbitrary"),
            vmem_limit_bytes=_vmem_limit_bytes(needed),
        ),
        cost_estimate=cost,
    )(query, key, value)
    return out


def _reference(query, key, value):
    d_k = query.shape[-1]
    scores = jnp.einsum("bqd,bkd->bqk", query.astype(jnp.float32),
                        key.astype(jnp.float32)) / jnp.sqrt(jnp.float32(d_k))
    attn = jax.nn.softmax(scores, axis=-1)
    out = jnp.einsum("bqk,bkd->bqd", attn, value.astype(jnp.float32))
    return out, attn


if __name__ == "__main__":
    key0 = jax.random.PRNGKey(0)
    kq, kk, kv = jax.random.split(key0, 3)

    B, S, D = 2, 8, 32
    query = jax.random.normal(kq, (B, S, D), dtype=jnp.float32)
    key = jax.random.normal(kk, (B, S, D), dtype=jnp.float32)
    value = jax.random.normal(kv, (B, S, D), dtype=jnp.float32)

    ref_out, ref_attn = _reference(query, key, value)

    # PyTorch-parity path: returns (output, attn).
    out, attn = scaled_dot_product_attention(query, key, value)
    out = jax.block_until_ready(out)
    attn = jax.block_until_ready(attn)
    assert jnp.allclose(out, ref_out, atol=2e-3, rtol=2e-3)
    assert jnp.allclose(attn, ref_attn, atol=2e-3, rtol=2e-3)

    # Flash-style path (no O(S^2) attention writeback): output only.
    out_flash = scaled_dot_product_attention(query, key, value, return_attn=False)
    out_flash = jax.block_until_ready(out_flash)
    assert jnp.allclose(out_flash, ref_out, atol=2e-3, rtol=2e-3)

    print("KERNEL_OK")
</pallas_src>

<mosaic_0001>
module attributes {stable_mosaic.version = 11 : i64} {
  func.func @_sdpa_attn_kernel(%arg0: i32, %arg1: i32, %arg2: memref<1x8x32xf32, #tpu.memory_space<vmem>>, %arg3: memref<1x8x32xf32, #tpu.memory_space<vmem>>, %arg4: memref<1x8x32xf32, #tpu.memory_space<vmem>>, %arg5: memref<1x8x32xf32, #tpu.memory_space<vmem>>, %arg6: memref<1x8x8xf32, #tpu.memory_space<vmem>>) attributes {dimension_semantics = [#tpu.dimension_semantics<parallel>, #tpu.dimension_semantics<parallel>], iteration_bounds = array<i64: 2, 1>, scalar_prefetch = 0 : i64, scratch_operands = 0 : i64, tpu.core_type = #tpu.core_type<tc>, window_params = [{transform_indices = @transform_0, window_bounds = array<i64: 1, 8, 32>}, {transform_indices = @transform_1, window_bounds = array<i64: 1, 8, 32>}, {transform_indices = @transform_2, window_bounds = array<i64: 1, 8, 32>}, {transform_indices = @transform_3, window_bounds = array<i64: 1, 8, 32>}, {transform_indices = @transform_4, window_bounds = array<i64: 1, 8, 8>}]} {
    %c0 = arith.constant 0 : index
    %c0_0 = arith.constant 0 : index
    %c0_1 = arith.constant 0 : index
    %0 = vector.load %arg2[%c0, %c0_0, %c0_1] : memref<1x8x32xf32, #tpu.memory_space<vmem>>, vector<1x8x32xf32>
    %1 = vector.shape_cast %0 : vector<1x8x32xf32> to vector<8x32xf32>
    %c0_2 = arith.constant 0 : index
    %c0_3 = arith.constant 0 : index
    %c0_4 = arith.constant 0 : index
    %2 = vector.load %arg3[%c0_2, %c0_3, %c0_4] : memref<1x8x32xf32, #tpu.memory_space<vmem>>, vector<1x8x32xf32>
    %3 = vector.shape_cast %2 : vector<1x8x32xf32> to vector<8x32xf32>
    %c0_5 = arith.constant 0 : index
    %c0_6 = arith.constant 0 : index
    %c0_7 = arith.constant 0 : index
    %4 = vector.load %arg4[%c0_5, %c0_6, %c0_7] : memref<1x8x32xf32, #tpu.memory_space<vmem>>, vector<1x8x32xf32>
    %5 = vector.shape_cast %4 : vector<1x8x32xf32> to vector<8x32xf32>
    %cst = arith.constant 0.176776692 : f32
    %6 = vector.broadcast %cst : f32 to vector<8x32xf32>
    %7 = arith.mulf %1, %6 : vector<8x32xf32>
    %cst_8 = arith.constant dense<0.000000e+00> : vector<8x8xf32>
    %8 = tpu.matmul %7, %3, %cst_8 {dimension_numbers = #tpu.dot_dimension_numbers<[1], [1], [0], [0], [0, 0, 1, 0], [], []>} : vector<8x32xf32>, vector<8x32xf32>, vector<8x8xf32> -> vector<8x8xf32>
    %cst_9 = arith.constant dense<0xFF800000> : vector<8xf32>
    %9 = vector.multi_reduction <maximumf>, %8, %cst_9 [1] : vector<8x8xf32> to vector<8xf32>
    %10 = vector.shape_cast %9 : vector<8xf32> to vector<8x1xf32>
    %11 = vector.broadcast %10 : vector<8x1xf32> to vector<8x8xf32>
    %12 = arith.subf %8, %11 : vector<8x8xf32>
    %13 = math.exp %12 : vector<8x8xf32>
    %cst_10 = arith.constant dense<0.000000e+00> : vector<8xf32>
    %14 = vector.multi_reduction <add>, %13, %cst_10 [1] : vector<8x8xf32> to vector<8xf32>
    %15 = vector.shape_cast %14 : vector<8xf32> to vector<8x1xf32>
    %16 = tpu.reciprocal %15 : vector<8x1xf32> -> vector<8x1xf32>
    %cst_11 = arith.constant dense<0.000000e+00> : vector<8x32xf32>
    %17 = tpu.matmul %13, %5, %cst_11 {dimension_numbers = #tpu.dot_dimension_numbers<[1], [0], [0], [1], [0, 0, 1, 1], [], []>} : vector<8x8xf32>, vector<8x32xf32>, vector<8x32xf32> -> vector<8x32xf32>
    %18 = vector.broadcast %16 : vector<8x1xf32> to vector<8x32xf32>
    %19 = arith.mulf %17, %18 : vector<8x32xf32>
    %c0_12 = arith.constant 0 : index
    %c0_13 = arith.constant 0 : index
    %c0_14 = arith.constant 0 : index
    %20 = vector.load %arg5[%c0_12, %c0_13, %c0_14] : memref<1x8x32xf32, #tpu.memory_space<vmem>>, vector<1x8x32xf32>
    %21 = vector.shape_cast %20 : vector<1x8x32xf32> to vector<8x32xf32>
    %22 = vector.shape_cast %19 : vector<8x32xf32> to vector<1x8x32xf32>
    tpu.vector_store %arg5[%c0_12, %c0_13, %c0_14], %22 {strides = array<i32>} : memref<1x8x32xf32, #tpu.memory_space<vmem>>, vector<1x8x32xf32>,
    %23 = vector.broadcast %16 : vector<8x1xf32> to vector<8x8xf32>
    %24 = arith.mulf %13, %23 : vector<8x8xf32>
    %c0_15 = arith.constant 0 : index
    %c0_16 = arith.constant 0 : index
    %c0_17 = arith.constant 0 : index
    %25 = vector.load %arg6[%c0_15, %c0_16, %c0_17] : memref<1x8x8xf32, #tpu.memory_space<vmem>>, vector<1x8x8xf32>
    %26 = vector.shape_cast %25 : vector<1x8x8xf32> to vector<8x8xf32>
    %27 = vector.shape_cast %24 : vector<8x8xf32> to vector<1x8x8xf32>
    tpu.vector_store %arg6[%c0_15, %c0_16, %c0_17], %27 {strides = array<i32>} : memref<1x8x8xf32, #tpu.memory_space<vmem>>, vector<1x8x8xf32>,
    return
  }
  func.func @transform_0(%arg0: i32, %arg1: i32) -> (i32, i32, i32) {
    %c0_i32 = arith.constant 0 : i32
    %c0_i32_0 = arith.constant 0 : i32
    return %arg0, %arg1, %c0_i32 : i32, i32, i32
  }
  func.func @transform_1(%arg0: i32, %arg1: i32) -> (i32, i32, i32) {
    %c0_i32 = arith.constant 0 : i32
    %c0_i32_0 = arith.constant 0 : i32
    %c0_i32_1 = arith.constant 0 : i32
    return %arg0, %c0_i32, %c0_i32_0 : i32, i32, i32
  }
  func.func @transform_2(%arg0: i32, %arg1: i32) -> (i32, i32, i32) {
    %c0_i32 = arith.constant 0 : i32
    %c0_i32_0 = arith.constant 0 : i32
    %c0_i32_1 = arith.constant 0 : i32
    return %arg0, %c0_i32, %c0_i32_0 : i32, i32, i32
  }
  func.func @transform_3(%arg0: i32, %arg1: i32) -> (i32, i32, i32) {
    %c0_i32 = arith.constant 0 : i32
    %c0_i32_0 = arith.constant 0 : i32
    return %arg0, %arg1, %c0_i32 : i32, i32, i32
  }
  func.func @transform_4(%arg0: i32, %arg1: i32) -> (i32, i32, i32) {
    %c0_i32 = arith.constant 0 : i32
    %c0_i32_0 = arith.constant 0 : i32
    return %arg0, %arg1, %c0_i32 : i32, i32, i32
  }
}

</mosaic_0001>

<bundles_post_ra>
// kernel: tpu_custom_call.1
= control target key start
LH: loop header
LB: loop body
LE: loop exit
PB: predicated region body
PF: predicated region fallthrough
CT: control target
= control target key end

     0   :  { %s1129_s0 = inlined_call_operand.hbm [shape: f32[2,8,32], index: 0, kind: input, shape index: {}]   ;;  %s1130_s1 = inlined_call_operand.hbm [shape: f32[2,8,32], index: 1, kind: input, shape index: {}]   ;;  %s1131_s2 = inlined_call_operand.hbm [shape: f32[2,8,32], index: 2, kind: input, shape index: {}]   ;;  %s1132_s3 = inlined_call_operand.hbm [shape: f32[2,8,32], index: 3, kind: output, shape index: {0}]   ;;  %s1133_s4 = inlined_call_operand.hbm [shape: f32[2,8,8], index: 4, kind: output, shape index: {1}]  }
   0x1   :  { %1137 = sst [smem:[#allocation19_spill]] %s1130_s1 }
   0x2   :  { %10 = vsyncpa [#allocation3], 0 }
   0x3   :  { %12 = vsyncpa [#allocation3 + $0x1], 0 }
   0x4   :  { %13 = vsyncpa [#allocation6], 0 }
   0x5   :  { %15 = vsyncpa [#allocation6 + $0x1], 0 }
   0x6   :  { %16 = vsyncpa [#allocation4], 0 }
   0x7   :  { %18 = vsyncpa [#allocation4 + $0x1], 0 }
   0x8   :  { %19 = vsyncpa [#allocation10], 0 }
   0x9   :  { %21 = vsyncpa [#allocation10 + $0x1], 0  ;;  %s937_s15 = smov 0   ;;  %s939_s16 = smov 0  }
   0xa   :  { %s941_s17 = smov 0   ;;  %s943_s18 = smov 0  }
   0xb   :  { %s945_s19 = smov 0   ;;  %s947_s20 = smov 0  }
   0xc LB: > { %1138 = sst [smem:[#allocation15_spill]] %s898_s17  ;;  %s968_s21 = sadd.s32 4294967295, %s910_s20   ;;  %s910_s20 = sphi %s947_s20, %s27_s20   ;;  %s906_s19 = sphi %s945_s19, %s1152_s19   ;;  %s902_s18 = sphi %s943_s18, %s1151_s18   ;;  %s898_s17 = sphi %s941_s17, %s1150_s17   ;;  %s894_s16 = sphi %s939_s16, %s1154_s16   ;;  %s890_s15 = sphi %s937_s15, %s1153_s15  }
   0xd   : > { %1139 = sst [smem:[#allocation16_spill]] %s906_s19  ;;  %s597_s22 = sadd.s32 4294967294, %s910_s20  }
   0xe   : > { %s39_s23 = sadd.s32 1, %s906_s19  ;;  %s48_s24 = sadd.s32 1, %s898_s17 }
   0xf   : > { %p41_p0 = scmp.ge.s32.totalorder %s39_s23, 2  ;;  %p55_p1 = scmp.ne.s32.totalorder %s898_s17, %s894_s16 }
  0x10   : > { %p56_p2 = scmp.eq.s32.totalorder %s910_s20, 0  ;;  %p61_p3 = scmp.ne.s32.totalorder %s894_s16, %s890_s15 }
  0x11   : > { %s1156_s23 = smov (%p41_p0, %s39_s23), 0  ;;  %p62_p5 = scmp.eq.s32.totalorder %s968_s21, 0 }
  0x12   : > { %1140 = sst [smem:[#allocation17_spill]] %s1156_s23  ;;  %p980_p4 = por %p56_p2, %p55_p1 }
  0x13   : > { %s43_s26 = ssub.s32 %s906_s19, %s1156_s23  ;;  %p139_p6 = scmp.eq.s32.totalorder %s968_s21, 1 }
  0x14   : > { %p46_p7 = scmp.eq.s32.totalorder %s43_s26, 0  ;;  %p988_p8 = por %p62_p5, %p61_p3 }
  0x15   : > { %p992_p9 = por %p139_p6, %p55_p1  ;;  %p145_p10 = scmp.eq.s32.totalorder %s597_s22, 1 }
  0x16   : > { %s997_s29 = scalar_select %p46_p7, %s898_s17, %s48_s24  }
  0x17   : > { %p999_p11 = por %p145_p10, %p61_p3  ;;  %p599_p12 = scmp.ge.s32.totalorder %s910_s20, 2 }
  0x18   : > { %1144 = sst [smem:[#allocation18_spill]] %s997_s29  ;;  %p648_p13 = scmp.lt.s32.totalorder %s910_s20, 2 }
  0x19   : > { %s193_s5 = sand.u32 1, %s898_s17   ;;  %s601_s7 = sshll.u32 %s906_s19, 3 }
  0x1a   : > { %s600_s6 = sshll.u32 %s193_s5, 3  ;;  %p1009_p0 = pnand %p648_p13, %p980_p4 }
  0x1b   : > { %s213_s9 = sand.u32 1, %s910_s20   ;;  %s1147_s1 = sld [smem:[#allocation19_spill]] }
  0x1c   : > { %s217_s14 = scalar_lea.vmem [#allocation5], %s600_s6  ;;  %s214_s24 = scalar_lea.sflag [#allocation6], %s213_s9 }
  0x1d   : > { %s225_s22 = sshll.u32 %s217_s14, 4  ;;  %p606_p1 = scmp.ge.s32.totalorder %s910_s20, 1  ;;  %s226_s22 = int_to_ptr.vmem [resolvable:$true] %s225_s22 }
  0x1e   : > { %p249_p2 = scmp.lt.s32.totalorder %s910_s20, 3  ;;  %s202_s10 = scalar_lea.hbm %s1129_s0, %s601_s7 }
  0x1f   : > { %s204_s11 = sshll.u32 %s202_s10, 4  ;;  %s194_s14 = scalar_lea.sflag [#allocation3], %s193_s5  ;;  %s205_s11 = int_to_ptr.hbm [resolvable:$true] %s204_s11 }
  0x20   : > { %p1021_p3 = pnand %p606_p1, %p249_p2  ;;  %s236_s29 = scalar_lea.vmem [#allocation7], %s600_s6 }
  0x21   : > { %s221_s12 = scalar_lea.hbm %s1147_s1, %s601_s7  ;;  %s244_s17 = sshll.u32 %s236_s29, 4  ;;  %s245_s17 = int_to_ptr.vmem [resolvable:$true] %s244_s17 }
  0x22   : > { %s223_s13 = sshll.u32 %s221_s12, 4  ;;  %s197_s12 = scalar_lea.vmem [#allocation2], %s600_s6  ;;  %s224_s13 = int_to_ptr.hbm [resolvable:$true] %s223_s13 }
  0x23   : > { %637 = dma.hbm_to_vmem [thread:$0]  (!%p1009_p0), %s224_s13, 128, %s226_s22, %s214_s24  }
  0x24   : > { %s206_s1 = sshll.u32 %s197_s12, 4  ;;  %s240_s22 = scalar_lea.hbm %s1131_s2, %s601_s7  ;;  %s207_s1 = int_to_ptr.vmem [resolvable:$true] %s206_s1 }
  0x25   : > { %634 = dma.hbm_to_vmem [thread:$0]  (!%p1009_p0), %s205_s11, 128, %s207_s1, %s194_s14  }
  0x26   : > { %s242_s19 = sshll.u32 %s240_s22, 4  ;;  %253 = sbr.rel (%p1021_p3) target bundleno = 456 (0x1c8), region = 32  ;;  %s243_s19 = int_to_ptr.hbm [resolvable:$true] %s242_s19 }
  0x27   : > { %640 = dma.hbm_to_vmem [thread:$0]  (!%p1009_p0), %s243_s19, 128, %s245_s17, %s214_s24  }
  0x28   : > { %s1038_s23 = sand.u32 (!%p1021_p3), 1, %s894_s16  }
  0x29   : > { %s1041_s1 = sshll.u32 (!%p1021_p3), %s1038_s23, 3  ;;  %s256_s5 = scalar_lea.sflag (!%p1021_p3), [#allocation3], %s1038_s23 }
  0x2a   : > { %s259_s7 = scalar_lea.vmem (!%p1021_p3), [#allocation2], %s1041_s1 }
  0x2b   : > { %873 = dma.done.wait (%p988_p8), %s256_s5, 128  }
  0x2c   : > { %875 = vsyncadd (%p988_p8), %s256_s5, 4294967168  ;;  %s265_s17 = sand.u32 1, %s968_s21   ;;  %s269_s29 = scalar_lea.vmem [#allocation5], %s1041_s1 }
  0x2d   : > { %s266_s19 = scalar_lea.sflag [#allocation6], %s265_s17 }
  0x2e   : > { %877 = dma.done.wait (%p988_p8), %s266_s19, 256  }
  0x2f   : > { %879 = vsyncadd (%p988_p8), %s266_s19, 4294967040  ;;  %vm324_vm0 = vcmask 261120   ;;  %v321_v0 = vld [vmem:[%s269_s29] sm:$0xff]  ;;  %v320_v1 = vld [vmem:[%s259_s7] sm:$0xff]  ;;  %vm351_vm1 = vcmask 64512   ;;  %s279_s21 = scalar_lea.vmem [#allocation7], %s1041_s1 }
  0x30   : > { %612 = vmatpush.xpose.msk.msra.mxu0 %vm324_vm0, %v321_v0  ;;  %v323_v2 = vmul.f32 0.17677669, %v320_v1  ;;  %v322_v5 = vld [vmem:[%s279_s21] sm:$0xff]  ;;  %s617_s27 = sshll.u32 %s902_s18, 3  ;;  %s312_s11 = scalar_lea.vmem [#allocation8], %s1041_s1 }
  0x31   : > { %393 = vmatpush.msra.mxu1 %v322_v5  ;;  %s419_s24 = scalar_lea.hbm %s1132_s3, %s617_s27  ;;  %s434_s10 = scalar_lea.hbm %s1133_s4, %s617_s27 }
  0x32   : > { %s1069_s12 = sshll.u32 %s312_s11, 4  ;;  %s423_s18 = sshll.u32 %s419_s24, 4  ;;  %s422_s12 = int_to_ptr.vmem [resolvable:$true] %s1069_s12  ;;  %s424_s18 = int_to_ptr.hbm [resolvable:$true] %s423_s18 }
  0x33   : > { %613 = vmatmul.msk.f32.vlgmr.msra.gmra.mxu0 %vm324_vm0, %v323_v2  ;;  %s319_s14 = scalar_lea.vmem [#allocation9], %s1041_s1  ;;  %s438_s13 = sshll.u32 %s434_s10, 4  ;;  %s1076_s13 = int_to_ptr.hbm [resolvable:$true] %s438_s13 }
  0x34   : > { %s1072_s9 = sshll.u32 %s319_s14, 4  ;;  %s403_s22 = scalar_lea.sflag [#allocation4], %s1038_s23  ;;  %s437_s9 = int_to_ptr.vmem [resolvable:$true] %s1072_s9 }
  0x35   : > { %s806_s5 = sshra.s32 %s424_s18, 4  ;;  %s812_s19 = scalar_lea.hbm %s1132_s3, 16  ;;  %s807_s5 = int_to_ptr.hbm [resolvable:$true] %s806_s5 }
  0x36   : > { %s808_s1 = scalar_lea.hbm %s807_s5, 8  ;;  %p813_p7 = scmp.lt.s32.totalorder %s807_s5, %s1132_s3 }
  0x37   : > { %p809_p4 = scmp.ne.s32.totalorder %s807_s5, %s808_s1  ;;  %p814_p8 = scmp.lt.s32.totalorder %s812_s19, %s808_s1 }
  0x39   : > { %p810_p5 = pnand %p809_p4, %p992_p9  ;;  %p815_p10 = por %p814_p8, %p813_p7 }
  0x3b   : > { %p811_p6 = pneg %p810_p5 }
  0x3d   : > { %p816_p13 = pnand %p815_p10, %p811_p6 }
  0xb0   : > { %v348_v3 = vpop.f32.mrf.mxu0 }
  0xb1   : > { %v352_v4 = vsel %vm351_vm1, %v348_v3, -inf }
  0xb2   : > { %353 = vmax.xlane.f32.xlu0 %v352_v4 }
 0x125   : > { %v354_v6 = vpop.xlane.xlu0 %353 }
 0x126   : > { %v355_v7 = vsub.f32 %v348_v3, %v354_v6 }
 0x128   : > { %v356_v8 = vmul.f32 1.442695, %v355_v7 }
 0x12a   : > { %698 = vpow2.f32 %v356_v8 }
 0x130   : > { %v699_v9 = vpop.eup %698 }
 0x131   : > { %614 = vmatmul.msk.f32.vlgmr.msra.gmra.mxu1 %vm351_vm1, %v699_v9  ;;  %v358_v10 = vsel %vm351_vm1, %v699_v9, 0.0 }
 0x132   : > { %359 = vadd.xlane.f32.xlu0 %v358_v10 }
 0x1a5   : > { %v360_v11 = vpop.xlane.xlu0 %359 }
 0x1a6   : > { %700 = vrcp.f32 %v360_v11  ;;  %v372_v15 = vand.u32 2147483648, %v360_v11  ;;  %v370_v17 = vand.u32 2147483647, %v360_v11  ;;  %vm366_vm3 = vweird.f32 %v360_v11 }
 0x1a8   : > { %v373_v19 = vor.u32 1.1754944e-38, %v372_v15  ;;  %vm371_vm5 = vcmp.eq.f32.partialorder %v370_v17, 8.507059e+37 }
 0x1ac   : > { %v701_v12 = vpop.eup %700 }
 0x1ad   : > { %v362_v13 = vmul.f32 %v701_v12, %v360_v11  ;;  %vm367_vm2 = vweird.f32 %v701_v12 }
 0x1ae   : > { %vm368_vm4 = vmor %vm366_vm3, %vm367_vm2  ;;  %v395_v22 = vpop.f32.mrf.mxu1 }
 0x1af   : > { %v363_v14 = vsub.f32 1.0, %v362_v13 }
 0x1b1   : > { %v364_v16 = vmul.f32 %v701_v12, %v363_v14 }
 0x1b3   : > { %v365_v18 = vadd.f32 %v701_v12, %v364_v16 }
 0x1b5   : > { %v369_v20 = vsel %vm368_vm4, %v701_v12, %v365_v18 }
 0x1b6   : > { %v374_v21 = vsel %vm371_vm5, %v373_v19, %v369_v20 }
 0x1b7   : > { %v398_v23 = vmul.f32 %v395_v22, %v374_v21  ;;  %v400_v24 = vmul.f32 %v699_v9, %v374_v21 }
 0x1b9   : > { %399 = vst.msk [vmem:[%s312_s11] sm:$0xff] %vm324_vm0, %v398_v23 }
 0x1ba   : > { %819 = shalt.err (!%p816_p13)
}
 0x1bb   : > { %627 = dma.vmem_to_hbm [thread:$0]  (%p992_p9), %s422_s12, 128, %s424_s18, %s403_s22   ;;  %401 = vst.msk [vmem:[%s319_s14] sm:$0xff] %vm351_vm1, %v400_v24 }
 0x1bc   : > { %s408_s27 = scalar_lea.sflag [#allocation10], %s1038_s23  ;;  %s834_s6 = sshra.s32 %s1076_s13, 4  ;;  %s835_s6 = int_to_ptr.hbm [resolvable:$true] %s834_s6 }
 0x1bd   : > { %s836_s8 = scalar_lea.hbm %s835_s6, 8  ;;  %s840_s26 = scalar_lea.hbm %s1133_s4, 16 }
 0x1be   : > { %p837_p0 = scmp.ne.s32.totalorder %s835_s6, %s836_s8  ;;  %p841_p3 = scmp.lt.s32.totalorder %s835_s6, %s1133_s4 }
 0x1bf   : > { %p842_p4 = scmp.lt.s32.totalorder %s840_s26, %s836_s8 }
 0x1c0   : > { %p838_p1 = pnand %p837_p0, %p992_p9 }
 0x1c1   : > { %p843_p5 = por %p842_p4, %p841_p3 }
 0x1c2   : > { %p839_p2 = pneg %p838_p1 }
 0x1c4   : > { %p844_p6 = pnand %p843_p5, %p839_p2 }
 0x1c6   : > { %847 = shalt.err (!%p844_p6)
}
 0x1c7   : > { %628 = dma.vmem_to_hbm [thread:$0]  (%p992_p9), %s437_s9, 128, %s1076_s13, %s408_s27  }
 0x1c8 PF: > { %s450_s23 = sand.u32 1, %s890_s15   ;;  %p642_p7 = pnand %p599_p12, %p999_p11 }
 0x1c9   : > { %s451_s12 = scalar_lea.sflag [#allocation4], %s450_s23 }
 0x1ca   : > { %p643_p8 = pneg %p642_p7 }
 0x1cc   : > { %881 = dma.done.wait (%p643_p8), %s451_s12, 128  }
 0x1cd   : > { %883 = vsyncadd (%p643_p8), %s451_s12, 4294967168  ;;  %s461_s18 = scalar_lea.sflag [#allocation10], %s450_s23 }
 0x1ce   : > { %885 = dma.done.wait (%p643_p8), %s461_s18, 128  }
 0x1cf   : > { %887 = vsyncadd (%p643_p8), %s461_s18, 4294967168  ;;  %s27_s20 = sadd.s32 1, %s910_s20   ;;  %s1149_s28 = sld [smem:[#allocation15_spill]] }
 0x1d0   : > { %p24_p10 = scmp.ge.s32.totalorder %s27_s20, 4   ;;  %s1150_s17 = sld [smem:[#allocation18_spill]] }
 0x1d1   : > { %s1151_s18 = sld [smem:[#allocation16_spill]]  ;;  %s1153_s15 = smov %s894_s16 }
 0x1d2   : > { %s1152_s19 = sld [smem:[#allocation17_spill]]  ;;  %26 = sbr.rel (!%p24_p10) target bundleno = 12 (0xc), region = 118 }
 0x1d5   : > { %s1154_s16 = smov %s1149_s28 }
 0x1d7   :  { %467 = vsyncpa [#allocation3], 1 }
 0x1d8   :  { %469 = vsyncpa [#allocation3 + $0x1], 1 }
 0x1d9   :  { %470 = vsyncpa [#allocation6], 1 }
 0x1da   :  { %472 = vsyncpa [#allocation6 + $0x1], 1 }
 0x1db   :  { %473 = vsyncpa [#allocation4], 1 }
 0x1dc   :  { %475 = vsyncpa [#allocation4 + $0x1], 1 }
 0x1dd   :  { %476 = vsyncpa [#allocation10], 1 }
 0x1de   :  { %478 = vsyncpa [#allocation10 + $0x1], 1 }

</bundles_post_ra>
